<compile_context>
chip_gen: v6e
topology: v6e:2x2x1
jax: 0.10.0
libtpu: 0.0.40
codegen_flags: <defaults>
</compile_context>

<pallas_src>
import functools

import numpy as np
import jax
import jax.numpy as jnp
from jax import lax
from jax.experimental import pallas as pl
from jax.experimental.pallas import tpu as pltpu


# ----------------------------------------------------------------------------
# pltpu.roll rotation-convention probe (+1 == matches jnp.roll semantics).
# ----------------------------------------------------------------------------
_ROLL_SIGN = None


def _roll_sign():
    global _ROLL_SIGN
    if _ROLL_SIGN is None:
        def probe(x_ref, o_ref):
            o_ref[...] = pltpu.roll(x_ref[...], 1, 1)

        x = lax.broadcasted_iota(jnp.float32, (8, 128), 1)
        y = pl.pallas_call(
            probe, out_shape=jax.ShapeDtypeStruct((8, 128), jnp.float32))(x)
        # jnp.roll convention: y[0,1] == x[0,0] == 0 ; opposite: y[0,1] == 2.
        _ROLL_SIGN = 1 if float(y[0, 1]) < 0.5 else -1
    return _ROLL_SIGN


# ----------------------------------------------------------------------------
# Kernel
# ----------------------------------------------------------------------------
def _stb_kernel(C, D, H, W, roll_sign,
                alpha_ref, w1_ref, b1_ref, w2_ref, b2_ref,   # SMEM (prefetch)
                masks_ref, x_ref, out_ref):
    """One (nb, C, L) block, L = D*H*W flattened into the lane axis."""
    S = H * W
    L = D * S

    x = x_ref[...].astype(jnp.float32)               # (nb, C, L)
    alpha = alpha_ref[0]
    a = jnp.where(x > 0, x, alpha * x)               # PReLU (single shared alpha)

    # {0,1} boundary masks (one lane row each), loaded once per block.
    m1 = [None] * 9
    for t in range(9):
        if t != 4:                                   # center tap needs no mask
            m1[t] = masks_ref[pl.ds(t, 1), :]        # (1, L)
    m2 = [masks_ref[pl.ds(9, 1), :], None, masks_ref[pl.ds(10, 1), :]]

    off1 = [dh * W + dw for dh in (-1, 0, 1) for dw in (-1, 0, 1)]
    off2 = [-S, 0, S]

    def tap(v, off, mask):
        # r[..., l] = v[..., l + off] inside the (D,H,W) box, else 0.
        # Any lane that wraps around in the rotation is guaranteed to be
        # zeroed by the mask, so rotate + multiply is exact.
        if off != 0:
            v = pltpu.roll(v, (-roll_sign * off) % L, v.ndim - 1)
        if mask is not None:
            v = v * mask
        return v

    # ---- conv1: kernel (1,3,3), padding (0,1,1).  ci-outer: the 9 shifted
    # views are built once and reused by every output channel; C independent
    # accumulators break the serial add chain.  Bias is added at the end. ----
    acc1 = [None] * C
    for ci in range(C):
        a_ci = a[:, ci, :]                           # (nb, L)
        taps = [tap(a_ci, off1[t], m1[t]) for t in range(9)]
        for co in range(C):
            base = (co * C + ci) * 9                 # w1[co, ci, 0, kh, kw]
            for t in range(9):
                term = w1_ref[base + t] * taps[t]
                acc1[co] = term if acc1[co] is None else acc1[co] + term
    y1 = [acc1[c] + b1_ref[c] for c in range(C)]     # (nb, L) each, stays in VMEM values

    # ---- conv2: kernel (3,1,1), padding (1,0,0); no scratch round-trip,
    # residual add fused into the store. -------------------------------------
    acc2 = [None] * C
    for ci in range(C):
        taps = [tap(y1[ci], off2[k], m2[k]) for k in range(3)]
        for co in range(C):
            base = (co * C + ci) * 3                 # w2[co, ci, kd]
            for k in range(3):
                term = w2_ref[base + k] * taps[k]
                acc2[co] = term if acc2[co] is None else acc2[co] + term

    for co in range(C):
        res = x[:, co, :] + acc2[co] + b2_ref[co]
        out_ref[:, co, :] = res.astype(out_ref.dtype)


# ----------------------------------------------------------------------------
# Host-side helpers + wrapper
# ----------------------------------------------------------------------------
def _build_masks(D, H, W):
    """{0,1} masks over the flattened L = D*H*W axis.

    Rows 0..8: conv1 taps (dh, dw) in row-major (-1,0,1)^2.
    Rows 9,10: conv2 taps dd = -1, +1.
    """
    S, L = H * W, D * H * W
    idx = np.arange(L)
    d = idx // S
    h = (idx // W) % H
    w = idx % W
    rows = []
    for dh in (-1, 0, 1):
        for dw in (-1, 0, 1):
            m = np.ones(L, np.float32)
            if dh == -1:
                m *= (h >= 1)
            elif dh == 1:
                m *= (h <= H - 2)
            if dw == -1:
                m *= (w >= 1)
            elif dw == 1:
                m *= (w <= W - 2)
            rows.append(m)
    rows.append((d >= 1).astype(np.float32))
    rows.append((d <= D - 2).astype(np.float32))
    return jnp.asarray(np.stack(rows, 0))            # (11, L)


def stb_block(x, params, nb=None):
    """x: (N, C, D, H, W).  params = (alpha, w1, b1, w2, b2) as in the module."""
    N, C, D, H, W = x.shape
    L = D * H * W
    alpha, w1, b1, w2, b2 = params

    f32 = jnp.float32
    xf = x.reshape(N, C, L)                          # free: memory already contiguous
    alpha_f = alpha.astype(f32).reshape(-1)[:1]
    w1f = w1.astype(f32).reshape(-1)                 # (C*C*9,)  [co, ci, kh, kw]
    b1f = b1.astype(f32).reshape(-1)
    w2f = w2.astype(f32).reshape(-1)                 # (C*C*3,)  [co, ci, kd]
    b2f = b2.astype(f32).reshape(-1)
    masks = _build_masks(D, H, W)
    M = masks.shape[0]

    # Batch several N per grid step so each block is O(100 KiB); re-derive the
    # budget per chip generation if the working set grows (v7x: 64 MiB VMEM).
    if nb is None:
        per_elem = C * L * x.dtype.itemsize
        nb = max(1, min(N, (128 * 1024) // max(per_elem, 1)))
        while N % nb:
            nb -= 1
    assert N % nb == 0

    kernel = functools.partial(_stb_kernel, C, D, H, W, _roll_sign())

    out = pl.pallas_call(
        kernel,
        out_shape=jax.ShapeDtypeStruct((N, C, L), x.dtype),
        grid_spec=pltpu.PrefetchScalarGridSpec(
            num_scalar_prefetch=5,                   # alpha, w1, b1, w2, b2 -> SMEM
            grid=(N // nb,),
            in_specs=[
                pl.BlockSpec((M, L), lambda n, *_: (0, 0)),        # masks
                pl.BlockSpec((nb, C, L), lambda n, *_: (n, 0, 0)),  # x
            ],
            out_specs=pl.BlockSpec((nb, C, L), lambda n, *_: (n, 0, 0)),
        ),
        compiler_params=pltpu.CompilerParams(
            dimension_semantics=("parallel",)),
    )(alpha_f, w1f, b1f, w2f, b2f, masks, xf)
    return out.reshape(N, C, D, H, W)


def stb_ref(x, params):
    """Pure-JAX reference matching the PyTorch module semantics."""
    alpha, w1, b1, w2, b2 = params
    a = jnp.where(x > 0, x, alpha[0] * x)
    dn = lax.conv_dimension_numbers(x.shape, w1.shape, ('NCDHW', 'OIDHW', 'NCDHW'))
    y1 = lax.conv_general_dilated(
        a, w1, (1, 1, 1), [(0, 0), (1, 1), (1, 1)], dimension_numbers=dn
    ) + b1.reshape(1, -1, 1, 1, 1)
    y2 = lax.conv_general_dilated(
        y1, w2, (1, 1, 1), [(1, 1), (0, 0), (0, 0)], dimension_numbers=dn
    ) + b2.reshape(1, -1, 1, 1, 1)
    return x + y2


if __name__ == "__main__":
    key = jax.random.PRNGKey(0)
    N, C, D, H, W = 8, 4, 8, 16, 16                  # NCDHW; L = D*H*W = 2048 lanes
    ks = jax.random.split(key, 5)

    x = jax.random.normal(ks[0], (N, C, D, H, W), jnp.float32)

    # Deterministic synthetic parameters (shapes from the module __init__).
    alpha = jnp.array([0.25], jnp.float32)           # nn.PReLU default init
    fan1 = C * 1 * 3 * 3
    bound1 = 1.0 / (fan1 ** 0.5)
    w1 = jax.random.uniform(ks[1], (C, C, 1, 3, 3), jnp.float32, -bound1, bound1)
    b1 = jax.random.uniform(ks[2], (C,), jnp.float32, -bound1, bound1)
    fan2 = C * 3 * 1 * 1
    bound2 = 1.0 / (fan2 ** 0.5)
    w2 = jax.random.uniform(ks[3], (C, C, 3, 1, 1), jnp.float32, -bound2, bound2)
    b2 = jax.random.uniform(ks[4], (C,), jnp.float32, -bound2, bound2)
    params = (alpha, w1, b1, w2, b2)

    out = jax.block_until_ready(stb_block(x, params))

    ref = stb_ref(x, params)
    max_err = float(jnp.max(jnp.abs(out - ref)))
    assert jnp.allclose(out, ref, atol=1e-4, rtol=1e-4), max_err
    print("KERNEL_OK")
</pallas_src>

<mosaic_0001>
module attributes {stable_mosaic.version = 11 : i64} {
  func.func @probe(%arg0: memref<8x128xf32, #tpu.memory_space<vmem>>, %arg1: memref<8x128xf32, #tpu.memory_space<vmem>>) attributes {dimension_semantics = [], scalar_prefetch = 0 : i64, scratch_operands = 0 : i64, tpu.core_type = #tpu.core_type<tc>} {
    %c0 = arith.constant 0 : index
    %c0_0 = arith.constant 0 : index
    %0 = vector.load %arg0[%c0, %c0_0] : memref<8x128xf32, #tpu.memory_space<vmem>>, vector<8x128xf32>
    %c1_i32 = arith.constant 1 : i32
    %1 = tpu.dynamic_rotate %0 by %c1_i32 dim 1 : vector<8x128xf32>, i32 -> vector<8x128xf32>
    %c0_1 = arith.constant 0 : index
    %c0_2 = arith.constant 0 : index
    %2 = vector.load %arg1[%c0_1, %c0_2] : memref<8x128xf32, #tpu.memory_space<vmem>>, vector<8x128xf32>
    tpu.vector_store %arg1[%c0_1, %c0_2], %1 {strides = array<i32>} : memref<8x128xf32, #tpu.memory_space<vmem>>, vector<8x128xf32>,
    return
  }
}

</mosaic_0001>

<bundles_post_ra>
// kernel: tpu_custom_call.1
= control target key start
LH: loop header
LB: loop body
LE: loop exit
PB: predicated region body
PF: predicated region fallthrough
CT: control target
= control target key end

     0   :  { %6 = vsyncpa [#allocation3], 0  ;;  %s106_s0 = inlined_call_operand.hbm [shape: f32[8,128], index: 0, kind: input, shape index: {}]   ;;  %s107_s1 = inlined_call_operand.hbm [shape: f32[8,128], index: 1, kind: output, shape index: {}]  }
   0x1   :  { %7 = vsyncpa [#allocation4], 0  ;;  %s87_s6 = smov [#allocation2]  }
   0x2   :  { %s14_s7 = sshll.u32 %s87_s6, 4  ;;  %s15_s7 = int_to_ptr.vmem [resolvable:$true] %s14_s7 }
   0x3   :  { %s51_s8 = scalar_lea.vmem %s15_s7, 128  ;;  %p56_p1 = scmp.lt.s32.totalorder %s15_s7, %s15_s7 }
   0x4   :  { %p52_p0 = scmp.ne.s32.totalorder %s15_s7, %s51_s8  ;;  %p57_p2 = scmp.lt.s32.totalorder %s51_s8, %s51_s8 }
   0x6   :  { %p58_p3 = por %p57_p2, %p56_p1 }
   0x8   :  { %p59_p4 = pnand %p58_p3, %p52_p0 }
   0xa   :  { %62 = shalt.err (!%p59_p4)
}
   0xb   :  { %17 = dma.hbm_to_vmem [thread:$0]  %s106_s0, 128, %s15_s7, [#allocation3]  }
   0xc   :  { %83 = dma.done.wait [#allocation3], 128  }
   0xd   :  { %84 = vsyncadd [#allocation3], 4294967168  ;;  %v21_v0 = vld [vmem:[#allocation2] sm:$0xff]  ;;  %s88_s11 = smov 1   ;;  %s89_s12 = smov [#allocation5]  }
   0xe   :  { %22 = vrot.lane.b32.xlu0 %v21_v0, %s88_s11  ;;  %s31_s13 = sshll.u32 %s89_s12, 4  ;;  %s32_s13 = int_to_ptr.vmem [resolvable:$true] %s31_s13 }
   0xf   :  { %s63_s14 = scalar_lea.vmem %s32_s13, 128  ;;  %p68_p6 = scmp.lt.s32.totalorder %s32_s13, %s32_s13 }
  0x10   :  { %p64_p5 = scmp.ne.s32.totalorder %s32_s13, %s63_s14  ;;  %p69_p7 = scmp.lt.s32.totalorder %s63_s14, %s63_s14 }
  0x12   :  { %p70_p8 = por %p69_p7, %p68_p6 }
  0x14   :  { %p71_p9 = pnand %p70_p8, %p64_p5 }
  0x80   :  { %v23_v1 = vpop.permute.xlu0 %22 }
  0x81   :  { %24 = vst [vmem:[#allocation5] sm:$0xff] %v23_v1 }
  0x82   :  { %74 = shalt.err (!%p71_p9)
}
  0x83   :  { %34 = dma.vmem_to_hbm [thread:$0]  %s32_s13, 128, %s107_s1, [#allocation4]  }
  0x84   :  { %85 = dma.done.wait [#allocation4], 128  }
  0x85   :  { %86 = vsyncadd [#allocation4], 4294967168 }
  0x86   :  { %38 = vsyncpa [#allocation3], 1 }
  0x87   :  { %39 = vsyncpa [#allocation4], 1 }

</bundles_post_ra>
